<compile_context>
chip_gen: v5e
topology: v5e:2x2
jax: 0.10.0
libtpu: 0.0.40
codegen_flags: <defaults>
</compile_context>

<pallas_src>
import functools
import math

import jax
import jax.numpy as jnp
from jax.experimental import pallas as pl
from jax.experimental.pallas import tpu as pltpu


def _anchor_kernel(off_ref, o_ref, *, stride, W, tile_w):
    # off_ref: VMEM (A*4, 1) f32 corner offsets (dx1, dy1, dx2, dy2 per anchor).
    # o_ref:   VMEM (A*4, tile_w) f32 tile of the flattened (A*4, Hw_padded) output.
    a4 = o_ref.shape[0]
    t = pl.program_id(1)  # spatial tile index (axis 0 is batch)

    # --- per-lane index math, computed once on a (1, tile_w) row -------------
    col = jax.lax.broadcasted_iota(jnp.int32, (1, tile_w), 1)
    flat = t * tile_w + col                     # flattened spatial index
    if (W & (W - 1)) == 0:                      # trace-time branch: W power of 2
        shift = W.bit_length() - 1
        i = flat >> shift                       # feature-map row
        j = flat & (W - 1)                      # feature-map col
    else:
        i = flat // W                           # only on (1, tile_w): cheap enough
        j = flat - i * W
    cx = j.astype(jnp.float32) * stride         # (1, tile_w) x centers
    cy = i.astype(jnp.float32) * stride         # (1, tile_w) y centers

    # --- per-channel parity mask, computed once on a (A*4, 1) column ---------
    rows = jax.lax.broadcasted_iota(jnp.int32, (a4, 1), 0)
    is_x = (rows % 2) == 0                      # even channels -> x coord

    # --- full-height work: one select + one add, lane-dense store ------------
    base = jnp.where(is_x, cx, cy)              # broadcast to (A*4, tile_w)
    o_ref[...] = base + off_ref[...]


def _pick_tile(total_padded, max_elems):
    """Largest 128-multiple tile that divides total_padded, <= max_elems, and
    leaves at least 2 grid steps when possible (v7x dual TensorCore)."""
    n_blocks = total_padded // 128
    if n_blocks <= 1:
        return 128
    cap_blocks = max(1, min(max_elems // 128, n_blocks // 2))
    best = 1
    for d in range(1, cap_blocks + 1):
        if n_blocks % d == 0:
            best = d
    return best * 128


def anchors_forward(x, stride,
                    sizes=(4.0, 4.0 * math.pow(2, 1 / 3), 4.0 * math.pow(2, 2 / 3)),
                    aspect_ratios=(0.5, 1.0, 2.0),
                    max_tile_elems=32768):
    """Compute anchors for feature map x of shape (B, C, H, W) -> (B, A*4, H, W)."""
    B, _, H, W = x.shape

    # Per-anchor corner offsets, precomputed in plain Python.
    # w*h = (size*stride)^2, aspect_ratio = h/w  =>  w = s*stride/sqrt(ar),
    # h = s*stride*sqrt(ar).
    offs = []
    for s in sizes:
        for ar in aspect_ratios:
            side = s * stride
            w = side / math.sqrt(ar)
            h = side * math.sqrt(ar)
            offs += [-w / 2.0, -h / 2.0, w / 2.0, h / 2.0]
    offsets = jnp.asarray(offs, dtype=jnp.float32).reshape(-1, 1)  # (A*4, 1)
    a4 = offsets.shape[0]

    total = H * W
    total_padded = ((total + 127) // 128) * 128      # lane-dense, unmasked stores
    tile_w = _pick_tile(total_padded, max_tile_elems)
    grid = (B, total_padded // tile_w)

    kernel = functools.partial(_anchor_kernel, stride=float(stride), W=W, tile_w=tile_w)

    flat = pl.pallas_call(
        kernel,
        out_shape=jax.ShapeDtypeStruct((B, a4, total_padded), jnp.float32),
        grid=grid,
        in_specs=[pl.BlockSpec((a4, 1), lambda b, t: (0, 0))],     # one DMA total
        out_specs=pl.BlockSpec((None, a4, tile_w), lambda b, t: (b, 0, t)),
        compiler_params=pltpu.CompilerParams(
            dimension_semantics=("parallel", "parallel"),
            vmem_limit_bytes=32 * 1024 * 1024),
    )(offsets)

    # Slice off spatial padding (no-op when H*W is already a multiple of 128).
    return flat[:, :, :total].reshape(B, a4, H, W)


def _reference(x, stride,
               sizes=(4.0, 4.0 * math.pow(2, 1 / 3), 4.0 * math.pow(2, 2 / 3)),
               aspect_ratios=(0.5, 1.0, 2.0)):
    """Pure-JAX reference for correctness checking."""
    B, _, H, W = x.shape
    offs = []
    for s in sizes:
        for ar in aspect_ratios:
            side = s * stride
            w = side / math.sqrt(ar)
            h = side * math.sqrt(ar)
            offs.append([-w / 2.0, -h / 2.0, w / 2.0, h / 2.0])
    offs = jnp.asarray(offs, dtype=jnp.float32)  # (A, 4)
    ii, jj = jnp.meshgrid(jnp.arange(H, dtype=jnp.float32),
                          jnp.arange(W, dtype=jnp.float32), indexing="ij")
    cy = ii * stride
    cx = jj * stride
    base = jnp.stack([cx, cy, cx, cy], axis=0)               # (4, H, W)
    anchors = base[None, :, :, :] + offs[:, :, None, None]   # (A, 4, H, W)
    anchors = anchors.reshape(-1, H, W)                      # (A*4, H, W)
    return jnp.broadcast_to(anchors[None], (B,) + anchors.shape)


if __name__ == "__main__":
    key = jax.random.PRNGKey(0)

    # Primary small-shape test (pow2 W, 2 spatial tiles, batch grid axis).
    B, C, H, W = 2, 4, 16, 16
    stride = 8
    x = jax.random.normal(key, (B, C, H, W), dtype=jnp.float32)
    out = jax.block_until_ready(anchors_forward(x, stride))
    ref = _reference(x, stride)
    assert out.shape == (B, 9 * 4, H, W), out.shape
    assert jnp.allclose(out, ref, atol=1e-5, rtol=1e-5), "mismatch vs reference"

    # Tiled path with a reduced tile cap (exercises multi-tile pipelining).
    B2, C2, H2, W2 = 1, 4, 32, 32
    stride2 = 4
    x2 = jax.random.normal(key, (B2, C2, H2, W2), dtype=jnp.float32)
    out2 = jax.block_until_ready(anchors_forward(x2, stride2, max_tile_elems=512))
    ref2 = _reference(x2, stride2)
    assert out2.shape == (B2, 9 * 4, H2, W2), out2.shape
    assert jnp.allclose(out2, ref2, atol=1e-5, rtol=1e-5), "mismatch vs reference (tiled)"

    # Non-power-of-two, non-128-aligned feature map (padding + divide fallback).
    B3, C3, H3, W3 = 2, 4, 7, 10
    stride3 = 16
    x3 = jax.random.normal(key, (B3, C3, H3, W3), dtype=jnp.float32)
    out3 = jax.block_until_ready(anchors_forward(x3, stride3))
    ref3 = _reference(x3, stride3)
    assert out3.shape == (B3, 9 * 4, H3, W3), out3.shape
    assert jnp.allclose(out3, ref3, atol=1e-5, rtol=1e-5), "mismatch vs reference (unaligned)"

    print("KERNEL_OK")
</pallas_src>

<mosaic_0001>
module attributes {stable_mosaic.version = 11 : i64} {
  func.func @_anchor_kernel(%arg0: i32, %arg1: i32, %arg2: memref<36x1xf32, #tpu.memory_space<vmem>>, %arg3: memref<1x36x128xf32, #tpu.memory_space<vmem>>) attributes {dimension_semantics = [#tpu.dimension_semantics<parallel>, #tpu.dimension_semantics<parallel>], iteration_bounds = array<i64: 2, 2>, scalar_prefetch = 0 : i64, scratch_operands = 0 : i64, tpu.core_type = #tpu.core_type<tc>, window_params = [{pipeline_mode = #tpu.pipeline_mode<synchronous>, transform_indices = @transform_0, window_bounds = array<i64: 36, 1>}, {transform_indices = @transform_1, window_bounds = array<i64: 1, 36, 128>}]} {
    %0 = tpu.iota {dimensions = array<i32: 1>} : vector<1x128xi32>
    %c128_i32 = arith.constant 128 : i32
    %1 = arith.muli %arg1, %c128_i32 : i32
    %2 = vector.broadcast %1 : i32 to vector<1x128xi32>
    %3 = arith.addi %2, %0 : vector<1x128xi32>
    %c4_i32 = arith.constant 4 : i32
    %4 = vector.broadcast %c4_i32 : i32 to vector<1x128xi32>
    %5 = arith.shrsi %3, %4 : vector<1x128xi32>
    %c15_i32 = arith.constant 15 : i32
    %6 = vector.broadcast %c15_i32 : i32 to vector<1x128xi32>
    %7 = arith.andi %3, %6 : vector<1x128xi32>
    %8 = arith.sitofp %7 : vector<1x128xi32> to vector<1x128xf32>
    %cst = arith.constant 8.000000e+00 : f32
    %9 = vector.broadcast %cst : f32 to vector<1x128xf32>
    %10 = arith.mulf %8, %9 : vector<1x128xf32>
    %11 = arith.sitofp %5 : vector<1x128xi32> to vector<1x128xf32>
    %cst_0 = arith.constant 8.000000e+00 : f32
    %12 = vector.broadcast %cst_0 : f32 to vector<1x128xf32>
    %13 = arith.mulf %11, %12 : vector<1x128xf32>
    %14 = tpu.iota {dimensions = array<i32: 0>} : vector<36x1xi32>
    %c2_i32 = arith.constant 2 : i32
    %c0_i32 = arith.constant 0 : i32
    %15 = arith.cmpi eq, %c2_i32, %c0_i32 : i32
    %c1_i32 = arith.constant 1 : i32
    %16 = arith.select %15, %c1_i32, %c2_i32 : i32
    %17 = vector.broadcast %16 : i32 to vector<36x1xi32>
    %18 = arith.remsi %14, %17 : vector<36x1xi32>
    %c0_i32_1 = arith.constant 0 : i32
    %19 = vector.broadcast %c0_i32_1 : i32 to vector<36x1xi32>
    %20 = arith.cmpi ne, %18, %19 : vector<36x1xi32>
    %c0_i32_2 = arith.constant 0 : i32
    %21 = vector.broadcast %c0_i32_2 : i32 to vector<36x1xi32>
    %22 = arith.cmpi slt, %18, %21 : vector<36x1xi32>
    %c0_i32_3 = arith.constant 0 : i32
    %23 = arith.cmpi slt, %16, %c0_i32_3 : i32
    %24 = vector.broadcast %23 : i1 to vector<36x1xi1>
    %25 = vector.broadcast %24 : vector<36x1xi1> to vector<36x1xi1>
    %26 = arith.xori %22, %25 : vector<36x1xi1>
    %27 = arith.andi %26, %20 : vector<36x1xi1>
    %28 = vector.broadcast %16 : i32 to vector<36x1xi32>
    %29 = arith.addi %18, %28 : vector<36x1xi32>
    %30 = arith.select %27, %29, %18 : vector<36x1xi1>, vector<36x1xi32>
    %c0_i32_4 = arith.constant 0 : i32
    %31 = vector.broadcast %c0_i32_4 : i32 to vector<36x1xi32>
    %32 = arith.cmpi eq, %30, %31 : vector<36x1xi32>
    %33 = vector.shape_cast %32 : vector<36x1xi1> to vector<36x1xi1>
    %34 = vector.broadcast %33 : vector<36x1xi1> to vector<36x128xi1>
    %35 = vector.shape_cast %10 : vector<1x128xf32> to vector<1x128xf32>
    %36 = vector.broadcast %35 : vector<1x128xf32> to vector<36x128xf32>
    %37 = vector.shape_cast %13 : vector<1x128xf32> to vector<1x128xf32>
    %38 = vector.broadcast %37 : vector<1x128xf32> to vector<36x128xf32>
    %39 = arith.select %34, %36, %38 : vector<36x128xi1>, vector<36x128xf32>
    %c0 = arith.constant 0 : index
    %c0_5 = arith.constant 0 : index
    %40 = vector.load %arg2[%c0, %c0_5] : memref<36x1xf32, #tpu.memory_space<vmem>>, vector<36x1xf32>
    %41 = vector.broadcast %40 : vector<36x1xf32> to vector<36x128xf32>
    %42 = arith.addf %39, %41 : vector<36x128xf32>
    %c0_6 = arith.constant 0 : index
    %c0_7 = arith.constant 0 : index
    %c0_8 = arith.constant 0 : index
    %43 = vector.load %arg3[%c0_6, %c0_7, %c0_8] : memref<1x36x128xf32, #tpu.memory_space<vmem>>, vector<1x36x128xf32>
    %44 = vector.shape_cast %43 : vector<1x36x128xf32> to vector<36x128xf32>
    %45 = vector.shape_cast %42 : vector<36x128xf32> to vector<1x36x128xf32>
    tpu.vector_store %arg3[%c0_6, %c0_7, %c0_8], %45 {strides = array<i32>} : memref<1x36x128xf32, #tpu.memory_space<vmem>>, vector<1x36x128xf32>,
    return
  }
  func.func @transform_0(%arg0: i32, %arg1: i32) -> (i32, i32) {
    %c0_i32 = arith.constant 0 : i32
    %c0_i32_0 = arith.constant 0 : i32
    %c0_i32_1 = arith.constant 0 : i32
    return %c0_i32, %c0_i32_0 : i32, i32
  }
  func.func @transform_1(%arg0: i32, %arg1: i32) -> (i32, i32, i32) {
    %c0_i32 = arith.constant 0 : i32
    %c0_i32_0 = arith.constant 0 : i32
    return %arg0, %c0_i32, %arg1 : i32, i32, i32
  }
}

</mosaic_0001>

<bundles_post_ra>
// kernel: tpu_custom_call.1
= control target key start
LH: loop header
LB: loop body
LE: loop exit
PB: predicated region body
PF: predicated region fallthrough
CT: control target
= control target key end

     0   :  { %s491_s6 = smov 0   ;;  %s493_s7 = smov 0   ;;  %s607_s0 = inlined_call_operand.vmem [shape: f32[36,1], index: 0, kind: input, shape index: {}]   ;;  %s608_s1 = inlined_call_operand.vmem [shape: f32[2,36,256], index: 1, kind: output, shape index: {}]  }
   0x1   :  { %s495_s8 = smov 0   ;;  %s497_s9 = smov 0  }
   0x2   :  { %s499_s10 = smov 0   ;;  %s501_s11 = smov 0  }
   0x3   :  { %s503_s12 = smov 0  }
   0x4 LB: > { %s20_s13 = sadd.s32 1, %s470_s10  ;;  %s23_s14 = sadd.s32 1, %s474_s11  ;;  %s478_s12 = sphi %s503_s12, %s11_s12   ;;  %s474_s11 = sphi %s501_s11, %s615_s11   ;;  %s470_s10 = sphi %s499_s10, %s614_s10   ;;  %s466_s9 = sphi %s497_s9, %s613_s9   ;;  %s462_s8 = sphi %s495_s8, %s612_s8   ;;  %s458_s7 = sphi %s493_s7, %s611_s7   ;;  %s454_s6 = sphi %s491_s6, %s610_s6  }
   0x5   : > { %p21_p0 = scmp.ge.s32.totalorder %s20_s13, 2  ;;  %s354_s15 = sadd.s32 4294967295, %s478_s12  }
   0x6   : > { %p63_p1 = scmp.ne.s32.totalorder %s458_s7, %s454_s6  ;;  %p64_p2 = scmp.eq.s32.totalorder %s354_s15, 3 }
   0x7   : > { %s617_s13 = smov (%p21_p0, %s20_s13), 0  ;;  %s619_s14 = smov (!%p21_p0, %s23_s14), %s474_s11 }
   0x8   : > { %s49_s16 = ssub.s32 %s470_s10, %s617_s13  ;;  %p25_p3 = scmp.ge.s32.totalorder %s619_s14, 2 }
   0x9   : > { %p357_p4 = scmp.ge.s32.totalorder %s478_s12, 1  ;;  %p537_p5 = por %p64_p2, %p63_p1 }
   0xa   : > { %p91_p6 = scmp.lt.s32.totalorder %s478_s12, 5  ;;  %s621_s14 = smov (%p25_p3, %s619_s14), 0 }
   0xb   : > { %s48_s18 = ssub.s32 %s474_s11, %s621_s14  ;;  %s53_s20 = sadd.s32 1, %s458_s7 }
   0xc   : > { %p92_p7 = pnand %p357_p4, %p91_p6  ;;  %s50_s19 = sor.u32 %s49_s16, %s48_s18 }
   0xd   : > { %p51_p8 = scmp.eq.s32.totalorder %s50_s19, 0  ;;  %s358_s3 = sshll.u32 (!%p92_p7), %s462_s8, 7 }
   0xe   : > { %95 = sbr.rel (%p92_p7) target bundleno = 156 (0x9c), region = 24  ;;  %s102_s4 = sand.u32 (!%p92_p7), 1, %s454_s6  }
   0xf   : > { %s548_s21 = scalar_select %p51_p8, %s458_s7, %s53_s20  }
  0x10   : > { %s362_s5 = smul.u32 (!%p92_p7), 40, %s102_s4 }
  0x12   : > { %s567_s15 = scalar_lea.vmem (!%p92_p7), [#allocation2], %s362_s5 }
  0x13   : > { %v204_v0 = vld [vmem:[%s607_s0 + $0x10] sm:$0xff]  ;;  %v202_v1 = vld [vmem:[%s607_s0] sm:$0xff]  ;;  %v480_v2 = vmov 0   ;;  %v205_v4 = vld [vmem:[%s607_s0 + $0x18] sm:$0xff]  ;;  %v105_v6 = vlaneseq  ;;  %v108_v8 = vstv %s358_s3  ;;  %s363_s6 = smul.u32 (%p537_p5), 10, %s466_s9 }
  0x14   : > { %422 = vset.pattern.permute.xlu1 %v480_v2  ;;  %421 = vset.pattern.permute.xlu0 %v480_v2  ;;  %v206_v3 = vld [vmem:[%s607_s0 + $0x20] sm:$0xf]  ;;  %v203_v5 = vld [vmem:[%s607_s0 + $0x8] sm:$0xff] }
  0x15   : > { %219 = vperm.xlu1 %422, %v204_v0   ;;  %209 = vperm.xlu0 %421, %v202_v1   ;;  %v106_v7 = vand.u32 127, %v105_v6  ;;  %v117_v12 = vshrl.u32 %v105_v6, 7  ;;  %s250_s16 = sadd.s32 (%p537_p5), %s462_s8, %s363_s6 }
  0x16   : > { %423 = vset.pattern.permute.xlu2 %v480_v2  ;;  %s359_s18 = sshll.u32 (%p537_p5), %s250_s16, 3 }
  0x17   : > { %229 = vperm.xlu2 %423, %v206_v3   ;;  %v109_v9 = vadd.s32 %v108_v8, %v106_v7  ;;  %v121_v15 = vadd.s32 32, %v117_v12  ;;  %v119_v22 = vadd.s32 16, %v117_v12  ;;  %v126_v24 = vand.u32 1, %v117_v12  ;;  %s252_s22 = scalar_lea.vmem (%p537_p5), %s608_s1, %s359_s18 }
  0x18   : > { %v120_v25 = vadd.s32 24, %v117_v12  ;;  %v118_v26 = vadd.s32 8, %v117_v12 }
  0x19   : > { %v110_v10 = vshra.s32 %v109_v9, 4  ;;  %v111_v11 = vand.u32 15, %v109_v9  ;;  %v154_v16 = vand.u32 1, %v121_v15  ;;  %v140_v23 = vand.u32 1, %v119_v22 }
  0x1a   : > { %vm182_vm2 = vcmp.eq.s32.totalorder %v126_v24, 0  ;;  %v147_v29 = vand.u32 1, %v120_v25  ;;  %v133_v30 = vand.u32 1, %v118_v26 }
  0x1b   : > { %v112_v13 = vcvt.s32.f32 %v111_v11  ;;  %v114_v14 = vcvt.s32.f32 %v110_v10  ;;  %vm186_vm0 = vcmp.eq.s32.totalorder %v154_v16, 0  ;;  %vm184_vm1 = vcmp.eq.s32.totalorder %v140_v23, 0 }
  0x1c   : > { %vm185_vm3 = vcmp.eq.s32.totalorder %v147_v29, 0  ;;  %vm183_vm4 = vcmp.eq.s32.totalorder %v133_v30, 0 }
  0x1d   : > { %224 = vperm.xlu1 %422, %v205_v4   ;;  %214 = vperm.xlu0 %421, %v203_v5   ;;  %v113_v17 = vmul.f32 8.0, %v112_v13  ;;  %v115_v18 = vmul.f32 8.0, %v114_v14 }
  0x1f   : > { %v201_v19 = vsel %vm186_vm0, %v113_v17, %v115_v18  ;;  %v199_v27 = vsel %vm184_vm1, %v113_v17, %v115_v18  ;;  %v197_v28 = vsel %vm182_vm2, %v113_v17, %v115_v18  ;;  %v200_v35 = vsel %vm185_vm3, %v113_v17, %v115_v18 }
  0x20   : > { %v198_v36 = vsel %vm183_vm4, %v113_v17, %v115_v18 }
  0x71   : > { %v230_v20 = vpop.permute.xlu2 %229 }
  0x72   : > { %v236_v21 = vadd.f32 %v230_v20, %v201_v19 }
  0x74   : > { %241 = vst [vmem:[%s567_s15 + $0x20] sm:$0xf] %v236_v21 }
  0x7b   : > { %v297_v45 = vld [vmem:[%s567_s15 + $0x20] sm:$0xff] (%p537_p5) }
  0x7c   : > { %298 = vst [vmem:[%s252_s22 + $0x40] sm:$0xff] (%p537_p5), %v297_v45 }
  0x87   : > { %v220_v31 = vpop.permute.xlu1 %219  ;;  %v210_v32 = vpop.permute.xlu0 %209 }
  0x88   : > { %v234_v33 = vadd.f32 %v220_v31, %v199_v27  ;;  %v232_v34 = vadd.f32 %v210_v32, %v197_v28 }
  0x8a   : > { %239 = vst [vmem:[%s567_s15 + $0x10] sm:$0xff] %v234_v33 }
  0x8b   : > { %237 = vst [vmem:[%s567_s15] sm:$0xff] %v232_v34 }
  0x8f   : > { %v225_v37 = vpop.permute.xlu1 %224  ;;  %v215_v38 = vpop.permute.xlu0 %214  ;;  %248 = sbr.rel (!%p537_p5) target bundleno = 156 (0x9c), region = 28 }
  0x90   : > { %v235_v39 = vadd.f32 %v225_v37, %v200_v35  ;;  %v233_v40 = vadd.f32 %v215_v38, %v198_v36 }
  0x91   : > { %v293_v43 = vld [vmem:[%s567_s15 + $0x10] sm:$0xff] (%p537_p5) }
  0x92   : > { %240 = vst [vmem:[%s567_s15 + $0x18] sm:$0xff] %v235_v39  ;;  %v289_v41 = vld [vmem:[%s567_s15] sm:$0xff] (%p537_p5) }
  0x93   : > { %238 = vst [vmem:[%s567_s15 + $0x8] sm:$0xff] %v233_v40 }
  0x94   : > { %290 = vst [vmem:[%s252_s22] sm:$0xff] %v289_v41 }
  0x95   : > { %294 = vst [vmem:[%s252_s22 + $0x20] sm:$0xff] %v293_v43 }
  0x99   : > { %v295_v44 = vld [vmem:[%s567_s15 + $0x18] sm:$0xff] }
  0x9a   : > { %v291_v42 = vld [vmem:[%s567_s15 + $0x8] sm:$0xff]  ;;  %296 = vst [vmem:[%s252_s22 + $0x30] sm:$0xff] %v295_v44 }
  0x9b   : > { %292 = vst [vmem:[%s252_s22 + $0x10] sm:$0xff] %v291_v42 }
  0x9c PF: > { %s11_s12 = sadd.s32 1, %s478_s12   ;;  %s610_s6 = smov %s458_s7 }
  0x9d   : > { %p8_p9 = scmp.ge.s32.totalorder %s11_s12, 6   ;;  %s611_s7 = smov %s548_s21 }
  0x9e   : > { %s612_s8 = smov %s470_s10  ;;  %s613_s9 = smov %s474_s11 }
  0x9f   : > { %s614_s10 = smov %s617_s13  ;;  %s615_s11 = smov %s621_s14 }
  0xa0   :  { %10 = sbr.rel (!%p8_p9) target bundleno = 4 (0x4), region = 89 }

</bundles_post_ra>
